<compile_context>
chip_gen: v7x
topology: tpu7x:2x2x1
jax: 0.10.0
libtpu: 0.0.40
codegen_flags: <defaults>
</compile_context>

<pallas_src>
import numpy as np
import jax
import jax.numpy as jnp
from jax.experimental import pallas as pl
from jax.experimental.pallas import tpu as pltpu

DEPTH = 9            # number of calibration depths / filters
FILTER_LEN = 51      # filter_length in the module
PAD = (FILTER_LEN - 1) // 2
FS = 40_000_000.0


def make_filters(depth: int = DEPTH, length: int = FILTER_LEN, fs: float = FS) -> np.ndarray:
    """Deterministic stand-in for firwin2-derived Wiener filters: (DEPTH, FILTER_LEN) f32."""
    n = np.arange(length) - (length - 1) / 2.0
    win = np.hamming(length)
    filters = []
    for d in range(depth):
        fc_norm = 0.05 + 0.04 * d          # depth-dependent normalized cutoff in (0, 0.5)
        h = 2.0 * fc_norm * np.sinc(2.0 * fc_norm * n) * win
        h = h / np.sum(h)
        filters.append(h)
    return np.stack(filters).astype(np.float32)


def _make_toeplitz_bank(filters: jnp.ndarray, H: int) -> jnp.ndarray:
    """T[d, i, j] = k_d[j - i + PAD]  (cross-correlation, F.conv2d semantics),
    zero outside the tap window -> 'same' zero padding is folded into the matrix."""
    i = jnp.arange(H)[:, None]
    j = jnp.arange(H)[None, :]
    tap = j - i + PAD                                   # (H, H)
    valid = (tap >= 0) & (tap < FILTER_LEN)
    tap_c = jnp.clip(tap, 0, FILTER_LEN - 1)
    bank = jnp.where(valid[None, :, :], filters[:, tap_c], 0.0)
    return bank.astype(jnp.float32)                     # (DEPTH, H, H)


def _fir_matmul_kernel(depth_ref, t_ref, x_ref, o_ref):
    # depth_ref: SMEM (Bp,) int32          -- scalar-prefetched per-sample filter index
    # t_ref    : VMEM (DEPTH, H, H) f32    -- Toeplitz filter bank (resident across steps)
    # x_ref    : VMEM (BB, 1, H, W)        -- BB input samples for this grid step
    # o_ref    : VMEM (BB, 1, H, W)
    b = pl.program_id(0)
    bb = o_ref.shape[0]
    for i in range(bb):                                  # static unroll over the batch block
        d = depth_ref[b * bb + i]                        # per-sample depth index (SMEM scalar)
        t = t_ref[d].astype(jnp.float32)                 # (H, H) banded filter matrix
        xi = x_ref[i, 0].astype(jnp.float32)             # (H, W)
        o_ref[i, 0] = jnp.dot(                           # one MXU matmul per sample
            t, xi, preferred_element_type=jnp.float32
        ).astype(o_ref.dtype)


def test_time_calibration_forward(x, y, depth, filters, *, block_batch: int = 8):
    """x: (B, 1, H, W) f32, depth: (B,) int, filters: (DEPTH, FILTER_LEN) f32. y is unused."""
    del y  # unused, matching the PyTorch forward
    B, C, H, W = x.shape
    assert C == 1, "module's FIR kernel has a single input channel"

    t_bank = _make_toeplitz_bank(jnp.asarray(filters, jnp.float32), H)   # (DEPTH, H, H)

    BB = min(block_batch, B)
    num_blocks = (B + BB - 1) // BB
    Bp = num_blocks * BB
    depth_i = depth.astype(jnp.int32)
    if Bp != B:                                          # pad batch to a multiple of BB
        x_in = jnp.pad(x, ((0, Bp - B), (0, 0), (0, 0), (0, 0)))
        depth_in = jnp.pad(depth_i, (0, Bp - B))
    else:
        x_in, depth_in = x, depth_i

    grid_spec = pltpu.PrefetchScalarGridSpec(
        num_scalar_prefetch=1,                           # depth indices -> SMEM
        grid=(num_blocks,),
        in_specs=[
            # Whole filter bank, constant block index -> DMA'd once, stays VMEM-resident.
            pl.BlockSpec((DEPTH, H, H), lambda b, dref: (0, 0, 0)),
            # BB samples per grid step, no padding of x needed (folded into T).
            pl.BlockSpec((BB, 1, H, W), lambda b, dref: (b, 0, 0, 0)),
        ],
        out_specs=pl.BlockSpec((BB, 1, H, W), lambda b, dref: (b, 0, 0, 0)),
    )

    out = pl.pallas_call(
        _fir_matmul_kernel,
        out_shape=jax.ShapeDtypeStruct((Bp, 1, H, W), x.dtype),
        grid_spec=grid_spec,
        compiler_params=pltpu.CompilerParams(
            dimension_semantics=("parallel",),           # batch axis independent (v7x 2 TCs)
        ),
    )(depth_in, t_bank, x_in)

    return out[:B] if Bp != B else out


def _reference(x, depth, filters):
    """Pure-JAX per-tap cross-correlation along H with 'same' zero padding (verification)."""
    B, C, H, W = x.shape
    xpad = jnp.pad(x, ((0, 0), (0, 0), (PAD, PAD), (0, 0)))
    outs = []
    for i in range(B):
        k = filters[int(depth[i])]
        acc = jnp.zeros((H, W), jnp.float32)
        for t in range(FILTER_LEN):
            acc = acc + xpad[i, 0, t:t + H, :] * k[t]
        outs.append(acc[None, None].astype(x.dtype))
    return jnp.concatenate(outs, axis=0)


if __name__ == "__main__":
    key = jax.random.PRNGKey(0)
    B, C, H, W = 4, 1, 64, 128
    x = jax.random.normal(key, (B, C, H, W), dtype=jnp.float32)
    y = None  # unused by forward, kept for signature parity with the nn.Module
    depth = jnp.array([0, 3, 5, 8], dtype=jnp.int32)     # per-sample depth index in [0, DEPTH)
    filters = jnp.asarray(make_filters())                # (9, 51) deterministic FIR bank

    out = test_time_calibration_forward(x, y, depth, filters)
    out = jax.block_until_ready(out)

    ref = _reference(x, depth, filters)
    assert out.shape == x.shape and out.dtype == x.dtype
    np.testing.assert_allclose(np.asarray(out), np.asarray(ref), atol=1e-4, rtol=1e-4)
    print("KERNEL_OK")
</pallas_src>

<mosaic_0001>
module attributes {stable_mosaic.version = 11 : i64} {
  func.func @_fir_matmul_kernel(%arg0: i32, %arg1: memref<4xi32, #tpu.memory_space<smem>>, %arg2: memref<9x64x64xf32, #tpu.memory_space<vmem>>, %arg3: memref<4x1x64x128xf32, #tpu.memory_space<vmem>>, %arg4: memref<4x1x64x128xf32, #tpu.memory_space<vmem>>) attributes {dimension_semantics = [#tpu.dimension_semantics<parallel>], iteration_bounds = array<i64: 1>, scalar_prefetch = 1 : i64, scratch_operands = 0 : i64, tpu.core_type = #tpu.core_type<tc>, window_params = [{pipeline_mode = #tpu.pipeline_mode<synchronous>, transform_indices = @transform_0, window_bounds = array<i64: 9, 64, 64>}, {transform_indices = @transform_1, window_bounds = array<i64: 4, 1, 64, 128>}, {transform_indices = @transform_2, window_bounds = array<i64: 4, 1, 64, 128>}]} {
    %c4_i32 = arith.constant 4 : i32
    %0 = arith.muli %arg0, %c4_i32 : i32
    %c0_i32 = arith.constant 0 : i32
    %1 = arith.addi %0, %c0_i32 : i32
    %2 = arith.index_cast %1 : i32 to index
    %3 = memref.load %arg1[%2] : memref<4xi32, #tpu.memory_space<smem>>
    %4 = arith.index_cast %3 : i32 to index
    %c0 = arith.constant 0 : index
    %c0_0 = arith.constant 0 : index
    %5 = vector.load %arg2[%4, %c0, %c0_0] : memref<9x64x64xf32, #tpu.memory_space<vmem>>, vector<1x64x64xf32>
    %6 = vector.shape_cast %5 : vector<1x64x64xf32> to vector<64x64xf32>
    %c0_1 = arith.constant 0 : index
    %c0_2 = arith.constant 0 : index
    %c0_3 = arith.constant 0 : index
    %c0_4 = arith.constant 0 : index
    %7 = vector.load %arg3[%c0_1, %c0_2, %c0_3, %c0_4] : memref<4x1x64x128xf32, #tpu.memory_space<vmem>>, vector<1x1x64x128xf32>
    %8 = vector.shape_cast %7 : vector<1x1x64x128xf32> to vector<64x128xf32>
    %cst = arith.constant dense<0.000000e+00> : vector<64x128xf32>
    %9 = tpu.matmul %6, %8, %cst {dimension_numbers = #tpu.dot_dimension_numbers<[1], [0], [0], [1], [0, 0, 1, 1], [], []>} : vector<64x64xf32>, vector<64x128xf32>, vector<64x128xf32> -> vector<64x128xf32>
    %c0_5 = arith.constant 0 : index
    %c0_6 = arith.constant 0 : index
    %c0_7 = arith.constant 0 : index
    %c0_8 = arith.constant 0 : index
    %10 = vector.load %arg4[%c0_5, %c0_6, %c0_7, %c0_8] : memref<4x1x64x128xf32, #tpu.memory_space<vmem>>, vector<1x1x64x128xf32>
    %11 = vector.shape_cast %10 : vector<1x1x64x128xf32> to vector<64x128xf32>
    %12 = vector.shape_cast %9 : vector<64x128xf32> to vector<1x1x64x128xf32>
    tpu.vector_store %arg4[%c0_5, %c0_6, %c0_7, %c0_8], %12 {strides = array<i32>} : memref<4x1x64x128xf32, #tpu.memory_space<vmem>>, vector<1x1x64x128xf32>,
    %c4_i32_9 = arith.constant 4 : i32
    %13 = arith.muli %arg0, %c4_i32_9 : i32
    %c1_i32 = arith.constant 1 : i32
    %14 = arith.addi %13, %c1_i32 : i32
    %15 = arith.index_cast %14 : i32 to index
    %16 = memref.load %arg1[%15] : memref<4xi32, #tpu.memory_space<smem>>
    %17 = arith.index_cast %16 : i32 to index
    %c0_10 = arith.constant 0 : index
    %c0_11 = arith.constant 0 : index
    %18 = vector.load %arg2[%17, %c0_10, %c0_11] : memref<9x64x64xf32, #tpu.memory_space<vmem>>, vector<1x64x64xf32>
    %19 = vector.shape_cast %18 : vector<1x64x64xf32> to vector<64x64xf32>
    %c1 = arith.constant 1 : index
    %c0_12 = arith.constant 0 : index
    %c0_13 = arith.constant 0 : index
    %c0_14 = arith.constant 0 : index
    %20 = vector.load %arg3[%c1, %c0_12, %c0_13, %c0_14] : memref<4x1x64x128xf32, #tpu.memory_space<vmem>>, vector<1x1x64x128xf32>
    %21 = vector.shape_cast %20 : vector<1x1x64x128xf32> to vector<64x128xf32>
    %cst_15 = arith.constant dense<0.000000e+00> : vector<64x128xf32>
    %22 = tpu.matmul %19, %21, %cst_15 {dimension_numbers = #tpu.dot_dimension_numbers<[1], [0], [0], [1], [0, 0, 1, 1], [], []>} : vector<64x64xf32>, vector<64x128xf32>, vector<64x128xf32> -> vector<64x128xf32>
    %c1_16 = arith.constant 1 : index
    %c0_17 = arith.constant 0 : index
    %c0_18 = arith.constant 0 : index
    %c0_19 = arith.constant 0 : index
    %23 = vector.load %arg4[%c1_16, %c0_17, %c0_18, %c0_19] : memref<4x1x64x128xf32, #tpu.memory_space<vmem>>, vector<1x1x64x128xf32>
    %24 = vector.shape_cast %23 : vector<1x1x64x128xf32> to vector<64x128xf32>
    %25 = vector.shape_cast %22 : vector<64x128xf32> to vector<1x1x64x128xf32>
    tpu.vector_store %arg4[%c1_16, %c0_17, %c0_18, %c0_19], %25 {strides = array<i32>} : memref<4x1x64x128xf32, #tpu.memory_space<vmem>>, vector<1x1x64x128xf32>,
    %c4_i32_20 = arith.constant 4 : i32
    %26 = arith.muli %arg0, %c4_i32_20 : i32
    %c2_i32 = arith.constant 2 : i32
    %27 = arith.addi %26, %c2_i32 : i32
    %28 = arith.index_cast %27 : i32 to index
    %29 = memref.load %arg1[%28] : memref<4xi32, #tpu.memory_space<smem>>
    %30 = arith.index_cast %29 : i32 to index
    %c0_21 = arith.constant 0 : index
    %c0_22 = arith.constant 0 : index
    %31 = vector.load %arg2[%30, %c0_21, %c0_22] : memref<9x64x64xf32, #tpu.memory_space<vmem>>, vector<1x64x64xf32>
    %32 = vector.shape_cast %31 : vector<1x64x64xf32> to vector<64x64xf32>
    %c2 = arith.constant 2 : index
    %c0_23 = arith.constant 0 : index
    %c0_24 = arith.constant 0 : index
    %c0_25 = arith.constant 0 : index
    %33 = vector.load %arg3[%c2, %c0_23, %c0_24, %c0_25] : memref<4x1x64x128xf32, #tpu.memory_space<vmem>>, vector<1x1x64x128xf32>
    %34 = vector.shape_cast %33 : vector<1x1x64x128xf32> to vector<64x128xf32>
    %cst_26 = arith.constant dense<0.000000e+00> : vector<64x128xf32>
    %35 = tpu.matmul %32, %34, %cst_26 {dimension_numbers = #tpu.dot_dimension_numbers<[1], [0], [0], [1], [0, 0, 1, 1], [], []>} : vector<64x64xf32>, vector<64x128xf32>, vector<64x128xf32> -> vector<64x128xf32>
    %c2_27 = arith.constant 2 : index
    %c0_28 = arith.constant 0 : index
    %c0_29 = arith.constant 0 : index
    %c0_30 = arith.constant 0 : index
    %36 = vector.load %arg4[%c2_27, %c0_28, %c0_29, %c0_30] : memref<4x1x64x128xf32, #tpu.memory_space<vmem>>, vector<1x1x64x128xf32>
    %37 = vector.shape_cast %36 : vector<1x1x64x128xf32> to vector<64x128xf32>
    %38 = vector.shape_cast %35 : vector<64x128xf32> to vector<1x1x64x128xf32>
    tpu.vector_store %arg4[%c2_27, %c0_28, %c0_29, %c0_30], %38 {strides = array<i32>} : memref<4x1x64x128xf32, #tpu.memory_space<vmem>>, vector<1x1x64x128xf32>,
    %c4_i32_31 = arith.constant 4 : i32
    %39 = arith.muli %arg0, %c4_i32_31 : i32
    %c3_i32 = arith.constant 3 : i32
    %40 = arith.addi %39, %c3_i32 : i32
    %41 = arith.index_cast %40 : i32 to index
    %42 = memref.load %arg1[%41] : memref<4xi32, #tpu.memory_space<smem>>
    %43 = arith.index_cast %42 : i32 to index
    %c0_32 = arith.constant 0 : index
    %c0_33 = arith.constant 0 : index
    %44 = vector.load %arg2[%43, %c0_32, %c0_33] : memref<9x64x64xf32, #tpu.memory_space<vmem>>, vector<1x64x64xf32>
    %45 = vector.shape_cast %44 : vector<1x64x64xf32> to vector<64x64xf32>
    %c3 = arith.constant 3 : index
    %c0_34 = arith.constant 0 : index
    %c0_35 = arith.constant 0 : index
    %c0_36 = arith.constant 0 : index
    %46 = vector.load %arg3[%c3, %c0_34, %c0_35, %c0_36] : memref<4x1x64x128xf32, #tpu.memory_space<vmem>>, vector<1x1x64x128xf32>
    %47 = vector.shape_cast %46 : vector<1x1x64x128xf32> to vector<64x128xf32>
    %cst_37 = arith.constant dense<0.000000e+00> : vector<64x128xf32>
    %48 = tpu.matmul %45, %47, %cst_37 {dimension_numbers = #tpu.dot_dimension_numbers<[1], [0], [0], [1], [0, 0, 1, 1], [], []>} : vector<64x64xf32>, vector<64x128xf32>, vector<64x128xf32> -> vector<64x128xf32>
    %c3_38 = arith.constant 3 : index
    %c0_39 = arith.constant 0 : index
    %c0_40 = arith.constant 0 : index
    %c0_41 = arith.constant 0 : index
    %49 = vector.load %arg4[%c3_38, %c0_39, %c0_40, %c0_41] : memref<4x1x64x128xf32, #tpu.memory_space<vmem>>, vector<1x1x64x128xf32>
    %50 = vector.shape_cast %49 : vector<1x1x64x128xf32> to vector<64x128xf32>
    %51 = vector.shape_cast %48 : vector<64x128xf32> to vector<1x1x64x128xf32>
    tpu.vector_store %arg4[%c3_38, %c0_39, %c0_40, %c0_41], %51 {strides = array<i32>} : memref<4x1x64x128xf32, #tpu.memory_space<vmem>>, vector<1x1x64x128xf32>,
    return
  }
  func.func @transform_0(%arg0: i32, %arg1: memref<4xi32, #tpu.memory_space<smem>>) -> (i32, i32, i32) {
    %c0_i32 = arith.constant 0 : i32
    %c0_i32_0 = arith.constant 0 : i32
    %c0_i32_1 = arith.constant 0 : i32
    %c0_i32_2 = arith.constant 0 : i32
    return %c0_i32, %c0_i32_0, %c0_i32_1 : i32, i32, i32
  }
  func.func @transform_1(%arg0: i32, %arg1: memref<4xi32, #tpu.memory_space<smem>>) -> (i32, i32, i32, i32) {
    %c0_i32 = arith.constant 0 : i32
    %c0_i32_0 = arith.constant 0 : i32
    %c0_i32_1 = arith.constant 0 : i32
    %c0_i32_2 = arith.constant 0 : i32
    return %arg0, %c0_i32, %c0_i32_0, %c0_i32_1 : i32, i32, i32, i32
  }
  func.func @transform_2(%arg0: i32, %arg1: memref<4xi32, #tpu.memory_space<smem>>) -> (i32, i32, i32, i32) {
    %c0_i32 = arith.constant 0 : i32
    %c0_i32_0 = arith.constant 0 : i32
    %c0_i32_1 = arith.constant 0 : i32
    %c0_i32_2 = arith.constant 0 : i32
    return %arg0, %c0_i32, %c0_i32_0, %c0_i32_1 : i32, i32, i32, i32
  }
}

</mosaic_0001>

<bundles_post_ra>
// kernel: tpu_custom_call.1
= control target key start
LH: loop header
LB: loop body
LE: loop exit
PB: predicated region body
PF: predicated region fallthrough
CT: control target
= control target key end

     0   :  { %s1236_s0 = inlined_call_operand.hbm [shape: s32[4], index: 0, kind: input, shape index: {}]   ;;  %s1237_s1 = inlined_call_operand.hbm [shape: f32[9,64,64], index: 1, kind: input, shape index: {}]   ;;  %s1238_s2 = inlined_call_operand.hbm [shape: f32[4,1,64,128], index: 2, kind: input, shape index: {}]   ;;  %s1239_s3 = inlined_call_operand.hbm [shape: f32[4,1,64,128], index: 3, kind: output, shape index: {}]  }
   0x1   :  { %s991_s14 = scalar_lea.hbm %s1236_s0, 16 }
   0x2   :  { %p992_p0 = scmp.ne.s32.totalorder %s1236_s0, %s991_s14  ;;  %p995_p1 = scmp.lt.u32.totalorder %s991_s14, %s1236_s0 }
   0x4   :  { %p997_p2 = pnand %p995_p1, %p992_p0 }
   0x6   :  { %1000 = shalt.err (!%p997_p2)  }
   0x7   :  { %s1075_s19 = smov [#allocation3]  }
   0x8   :  { %9 = dma.hbm_to_smem %s1236_s0, 16, %s1075_s19, [#allocation2] }
   0x9   :  { %1067 = dma.done.wait [#allocation2], 16 }
   0xa   :  { %1068 = vsyncadd [#allocation2], 4294967280 }
   0xb   :  { %11 = sfence }
   0xc   :  { %12 = vsyncpa [#allocation5], 0 }
   0xd   :  { %13 = vsyncpa [#allocation8], 0 }
   0xe   :  { %14 = vsyncpa [#allocation6], 0  ;;  %s1076_s22 = smov [#allocation4]   ;;  %s1001_s26 = scalar_lea.hbm %s1237_s1, 9216 }
   0xf   :  { %s20_s23 = sshll.u32 %s1076_s22, 4  ;;  %p1002_p3 = scmp.ne.s32.totalorder %s1237_s1, %s1001_s26  ;;  %s21_s23 = int_to_ptr.vmem [resolvable:$true] %s20_s23 }
  0x10   :  { %p1005_p4 = scmp.lt.u32.totalorder %s1001_s26, %s1237_s1 }
  0x12   :  { %p1007_p5 = pnand %p1005_p4, %p1002_p3 }
  0x14   :  { %1010 = shalt.err (!%p1007_p5)
}
  0x15   :  { %s1011_s0 = scalar_lea.vmem %s21_s23, 9216  ;;  %p1016_p7 = scmp.lt.s32.totalorder %s21_s23, %s21_s23 }
  0x16   :  { %p1012_p6 = scmp.ne.s32.totalorder %s21_s23, %s1011_s0  ;;  %p1017_p8 = scmp.lt.s32.totalorder %s1011_s0, %s1011_s0 }
  0x18   :  { %p1018_p9 = por %p1017_p8, %p1016_p7 }
  0x1a   :  { %p1019_p10 = pnand %p1018_p9, %p1012_p6 }
  0x1c   :  { %1022 = shalt.err (!%p1019_p10)
}
  0x1d   :  { %s1077_s4 = smov 128   ;;  %s1078_s5 = smov 8  }
  0x1e   :  { %26 = dma.hbm_to_vmem [thread:$0]  %s1237_s1, 9216, %s21_s23, [#allocation5], %s1077_s4, %s1077_s4, %s1078_s5  }
  0x1f   :  { %s1079_s8 = smov [#allocation7]   ;;  %s1023_s12 = scalar_lea.hbm %s1238_s2, 4096 }
  0x20   :  { %s32_s9 = sshll.u32 %s1079_s8, 4  ;;  %p1024_p11 = scmp.ne.s32.totalorder %s1238_s2, %s1023_s12  ;;  %s33_s9 = int_to_ptr.vmem [resolvable:$true] %s32_s9 }
  0x21   :  { %p1027_p12 = scmp.lt.u32.totalorder %s1023_s12, %s1238_s2 }
  0x23   :  { %p1029_p13 = pnand %p1027_p12, %p1024_p11 }
  0x25   :  { %1032 = shalt.err (!%p1029_p13)
}
  0x26   :  { %s1033_s17 = scalar_lea.vmem %s33_s9, 4096  ;;  %p1038_p1 = scmp.lt.s32.totalorder %s33_s9, %s33_s9 }
  0x27   :  { %p1034_p0 = scmp.ne.s32.totalorder %s33_s9, %s1033_s17  ;;  %p1039_p2 = scmp.lt.s32.totalorder %s1033_s17, %s1033_s17 }
  0x29   :  { %p1040_p3 = por %p1039_p2, %p1038_p1 }
  0x2b   :  { %p1041_p4 = pnand %p1040_p3, %p1034_p0 }
  0x2d   :  { %1044 = shalt.err (!%p1041_p4)
}
  0x2e   :  { %38 = dma.hbm_to_vmem [thread:$0]  %s1238_s2, 4096, %s33_s9, [#allocation8], %s1077_s4, %s1077_s4, %s1078_s5  }
  0x2f   :  { %1069 = dma.done.wait [#allocation5], 9216  }
  0x30   :  { %1070 = vsyncadd [#allocation5], 4294958080 }
  0x31   :  { %1071 = dma.done.wait [#allocation8], 4096  }
  0x32   :  { %1072 = vsyncadd [#allocation8], 4294963200  ;;  %s46_s19 = sld [smem:[#allocation3]]  ;;  %s715_s20 = sld [smem:[#allocation3 + $0x1]]  ;;  %v57_v0 = vld [vmem:[#allocation7] sm:$0xff]  ;;  %v58_v1 = vld [vmem:[#allocation7 + $0x8] sm:$0xff] }
  0x33   :  { %v216_v2 = vld [vmem:[#allocation7 + $0x40] sm:$0xff]  ;;  %v921_v3 = vpack.c.bf16 %v58_v1, %v57_v0  ;;  %v217_v4 = vld [vmem:[#allocation7 + $0x48] sm:$0xff]  ;;  %v59_v5 = vld [vmem:[#allocation7 + $0x10] sm:$0xff]  ;;  %vm65_vm0 = vcmask 523264   ;;  %s1152_s24 = sld [smem:[#allocation3 + $0x2]]  ;;  %s1155_s25 = sld [smem:[#allocation3 + $0x3]] }
  0x34   :  { %v60_v6 = vld [vmem:[#allocation7 + $0x18] sm:$0xff]  ;;  %v937_v7 = vpack.c.bf16 %v217_v4, %v216_v2  ;;  %v218_v9 = vld [vmem:[#allocation7 + $0x50] sm:$0xff]  ;;  %v61_v11 = vld [vmem:[#allocation7 + $0x20] sm:$0xff]  ;;  %s1080_s30 = smov [#allocation9]  }
  0x35   :  { %v925_v8 = vpack.c.bf16 %v60_v6, %v59_v5  ;;  %v219_v10 = vld [vmem:[#allocation7 + $0x58] sm:$0xff]  ;;  %922 = vmatprep.subr.bf16.mxu0 %v921_v3  ;;  %v62_v13 = vld [vmem:[#allocation7 + $0x28] sm:$0xff]  ;;  %v220_v14 = vld [vmem:[#allocation7 + $0x60] sm:$0xff]  ;;  %s685_s0 = sshll.u32 %s1080_s30, 4  ;;  %s686_s0 = int_to_ptr.vmem [resolvable:$true] %s685_s0 }
  0x36   :  { %v941_v12 = vpack.c.bf16 %v219_v10, %v218_v9  ;;  %v221_v15 = vld [vmem:[#allocation7 + $0x68] sm:$0xff]  ;;  %938 = vmatprep.subr.bf16.mxu1 %v937_v7  ;;  %924 = vmatpush3.bf16.msra.mxu0 %v921_v3  ;;  %v929_v16 = vpack.c.bf16 %v62_v13, %v61_v11  ;;  %v63_v20 = vld [vmem:[#allocation7 + $0x30] sm:$0xff]  ;;  %v64_v21 = vld [vmem:[#allocation7 + $0x38] sm:$0xff]  ;;  %s1045_s6 = scalar_lea.vmem %s686_s0, 4096  ;;  %p1050_p6 = scmp.lt.s32.totalorder %s686_s0, %s686_s0 }
  0x37   :  { %940 = vmatpush3.bf16.msra.mxu1 %v937_v7  ;;  %926 = vmatprep.subr.bf16.mxu0 %v925_v8  ;;  %v945_v19 = vpack.c.bf16 %v221_v15, %v220_v14  ;;  %v222_v22 = vld [vmem:[#allocation7 + $0x70] sm:$0xff]  ;;  %v223_v23 = vld [vmem:[#allocation7 + $0x78] sm:$0xff]  ;;  %v933_v24 = vpack.c.bf16 %v64_v21, %v63_v20  ;;  %v375_v26 = vld [vmem:[#allocation7 + $0x80] sm:$0xff]  ;;  %p1046_p5 = scmp.ne.s32.totalorder %s686_s0, %s1045_s6  ;;  %p1051_p7 = scmp.lt.s32.totalorder %s1045_s6, %s1045_s6 }
  0x38   :  { %s706_s21 = sshll.u32 %s46_s19, 6  ;;  %s716_s22 = sshll.u32 %s715_s20, 6  ;;  %942 = vmatprep.subr.bf16.mxu1 %v941_v12  ;;  %v949_v25 = vpack.c.bf16 %v223_v23, %v222_v22  ;;  %v376_v27 = vld [vmem:[#allocation7 + $0x88] sm:$0xff]  ;;  %v534_v28 = vld [vmem:[#allocation7 + $0xc0] sm:$0xff]  ;;  %v377_v32 = vld [vmem:[#allocation7 + $0x90] sm:$0xff] }
  0x39   :  { %s1143_s2 = scalar_lea.vmem [#allocation4], %s706_s21  ;;  %s1146_s23 = scalar_lea.vmem [#allocation4], %s716_s22  ;;  %v535_v29 = vld [vmem:[#allocation7 + $0xc8] sm:$0xff]  ;;  %v953_v30 = vpack.c.bf16 %v376_v27, %v375_v26  ;;  %v378_v33 = vld [vmem:[#allocation7 + $0x98] sm:$0xff]  ;;  %v536_v35 = vld [vmem:[#allocation7 + $0xd0] sm:$0xff] }
  0x3a   :  { %v49_v17 = vld [vmem:[%s1143_s2] sm:$0xff]  ;;  %928 = vmatpush3.bf16.msra.mxu0 %v925_v8  ;;  %v969_v31 = vpack.c.bf16 %v535_v29, %v534_v28  ;;  %v50_v34 = vld [vmem:[%s1143_s2 + $0x8] sm:$0xff]  ;;  %v537_v36 = vld [vmem:[#allocation7 + $0xd8] sm:$0xff]  ;;  %v957_v39 = vpack.c.bf16 %v378_v33, %v377_v32  ;;  %s726_s26 = sshll.u32 %s1152_s24, 6  ;;  %s736_s27 = sshll.u32 %s1155_s25, 6 }
  0x3b   :  { %v207_v18 = vld [vmem:[%s1146_s23] sm:$0xff]  ;;  %825 = vmatprep.mubr.msk.f32.mxu0 %vm65_vm0, %v49_v17  ;;  %944 = vmatpush3.bf16.msra.mxu1 %v941_v12  ;;  %v208_v37 = vld [vmem:[%s1146_s23 + $0x8] sm:$0xff]  ;;  %v51_v38 = vld [vmem:[%s1143_s2 + $0x10] sm:$0xff]  ;;  %v973_v41 = vpack.c.bf16 %v537_v36, %v536_v35  ;;  %s1183_s28 = scalar_lea.vmem [#allocation4], %s726_s26  ;;  %s1187_s29 = scalar_lea.vmem [#allocation4], %s736_s27 }
  0x3c   :  { %853 = vmatprep.mubr.msk.f32.mxu1 %vm65_vm0, %v207_v18  ;;  %930 = vmatprep.subr.bf16.mxu0 %v929_v16  ;;  %v209_v40 = vld [vmem:[%s1146_s23 + $0x10] sm:$0xff]  ;;  %v379_v42 = vld [vmem:[#allocation7 + $0xa0] sm:$0xff]  ;;  %v380_v43 = vld [vmem:[#allocation7 + $0xa8] sm:$0xff]  ;;  %p1052_p8 = por %p1051_p7, %p1050_p6 }
  0x3d   :  { %946 = vmatprep.subr.bf16.mxu1 %v945_v19  ;;  %v52_v44 = vld [vmem:[%s1143_s2 + $0x18] sm:$0xff]  ;;  %v538_v45 = vld [vmem:[#allocation7 + $0xe0] sm:$0xff]  ;;  %v539_v46 = vld [vmem:[#allocation7 + $0xe8] sm:$0xff]  ;;  %v961_v49 = vpack.c.bf16 %v380_v43, %v379_v42 }
  0x3e   :  { %932 = vmatpush3.bf16.msra.mxu0 %v929_v16  ;;  %v210_v47 = vld [vmem:[%s1146_s23 + $0x18] sm:$0xff]  ;;  %v53_v48 = vld [vmem:[%s1143_s2 + $0x20] sm:$0xff]  ;;  %v977_v51 = vpack.c.bf16 %v539_v46, %v538_v45  ;;  %v381_v52 = vld [vmem:[#allocation7 + $0xb0] sm:$0xff]  ;;  %p1053_p9 = pnand %p1052_p8, %p1046_p5 }
  0x3f   :  { %948 = vmatpush3.bf16.msra.mxu1 %v945_v19  ;;  %934 = vmatprep.subr.bf16.mxu0 %v933_v24  ;;  %v211_v50 = vld [vmem:[%s1146_s23 + $0x20] sm:$0xff]  ;;  %v382_v53 = vld [vmem:[#allocation7 + $0xb8] sm:$0xff]  ;;  %v54_v54 = vld [vmem:[%s1143_s2 + $0x28] sm:$0xff] }
  0x40   :  { %950 = vmatprep.subr.bf16.mxu1 %v949_v25  ;;  %v540_v55 = vld [vmem:[#allocation7 + $0xf0] sm:$0xff]  ;;  %v541_v56 = vld [vmem:[#allocation7 + $0xf8] sm:$0xff]  ;;  %v212_v57 = vld [vmem:[%s1146_s23 + $0x28] sm:$0xff]  ;;  %v965_v59 = vpack.c.bf16 %v382_v53, %v381_v52 }
  0x41   :  { %v55_v58 = vld [vmem:[%s1143_s2 + $0x30] sm:$0xff]  ;;  %v981_v61 = vpack.c.bf16 %v541_v56, %v540_v55  ;;  %v56_v62 = vld [vmem:[%s1143_s2 + $0x38] sm:$0xff]  ;;  %v366_v0 = vld [vmem:[%s1183_s28] sm:$0xff] }
  0x42   :  { %936 = vmatpush3.bf16.msra.mxu0 %v933_v24  ;;  %v213_v60 = vld [vmem:[%s1146_s23 + $0x30] sm:$0xff]  ;;  %v214_v63 = vld [vmem:[%s1146_s23 + $0x38] sm:$0xff]  ;;  %v525_v1 = vld [vmem:[%s1187_s29] sm:$0xff] }
  0x43   :  { %952 = vmatpush3.bf16.msra.mxu1 %v949_v25  ;;  %954 = vmatprep.subr.bf16.mxu0 %v953_v30  ;;  %v367_v2 = vld [vmem:[%s1183_s28 + $0x8] sm:$0xff]  ;;  %v368_v4 = vld [vmem:[%s1183_s28 + $0x10] sm:$0xff]  ;;  %v369_v6 = vld [vmem:[%s1183_s28 + $0x18] sm:$0xff] }
  0x44   :  { %970 = vmatprep.subr.bf16.mxu1 %v969_v31  ;;  %v526_v3 = vld [vmem:[%s1187_s29 + $0x8] sm:$0xff]  ;;  %v527_v5 = vld [vmem:[%s1187_s29 + $0x10] sm:$0xff]  ;;  %v528_v7 = vld [vmem:[%s1187_s29 + $0x18] sm:$0xff] }
  0x45   :  { %826 = vmatmul.mubr.msk.f32.vlgmr.msra.gmra.mrb[0].mxu0 %vm65_vm0, %v50_v34  ;;  %v370_v8 = vld [vmem:[%s1183_s28 + $0x20] sm:$0xff]  ;;  %v371_v10 = vld [vmem:[%s1183_s28 + $0x28] sm:$0xff]  ;;  %v372_v12 = vld [vmem:[%s1183_s28 + $0x30] sm:$0xff] }
  0x46   :  { %854 = vmatmul.mubr.msk.f32.vlgmr.msra.gmra.mrb[0].mxu1 %vm65_vm0, %v208_v37  ;;  %956 = vmatpush3.bf16.msra.mxu0 %v953_v30  ;;  %v529_v9 = vld [vmem:[%s1187_s29 + $0x20] sm:$0xff]  ;;  %v530_v11 = vld [vmem:[%s1187_s29 + $0x28] sm:$0xff]  ;;  %v531_v13 = vld [vmem:[%s1187_s29 + $0x30] sm:$0xff] }
  0x47   :  { %972 = vmatpush3.bf16.msra.mxu1 %v969_v31  ;;  %828 = vmatprep.mubr.msk.f32.mxu0 %vm65_vm0, %v51_v38  ;;  %v373_v14 = vld [vmem:[%s1183_s28 + $0x38] sm:$0xff] }
  0x48   :  { %856 = vmatprep.mubr.msk.f32.mxu1 %vm65_vm0, %v209_v40  ;;  %958 = vmatprep.subr.bf16.mxu0 %v957_v39  ;;  %v532_v15 = vld [vmem:[%s1187_s29 + $0x38] sm:$0xff] }
  0x49   :  { %829 = vmatmul.mubr.msk.f32.gmra.mrb[2].mxu0 %vm65_vm0, %v52_v44  ;;  %974 = vmatprep.subr.bf16.mxu1 %v973_v41 }
  0x4a   :  { %857 = vmatmul.mubr.msk.f32.gmra.mrb[2].mxu1 %vm65_vm0, %v210_v47  ;;  %960 = vmatpush3.bf16.msra.mxu0 %v957_v39 }
  0x4b   :  { %976 = vmatpush3.bf16.msra.mxu1 %v973_v41  ;;  %831 = vmatprep.mubr.msk.f32.mxu0 %vm65_vm0, %v53_v48 }
  0x4c   :  { %859 = vmatprep.mubr.msk.f32.mxu1 %vm65_vm0, %v211_v50  ;;  %962 = vmatprep.subr.bf16.mxu0 %v961_v49 }
  0x4d   :  { %832 = vmatmul.mubr.msk.f32.gmra.mrb[4].mxu0 %vm65_vm0, %v54_v54  ;;  %978 = vmatprep.subr.bf16.mxu1 %v977_v51 }
  0x4e   :  { %860 = vmatmul.mubr.msk.f32.gmra.mrb[4].mxu1 %vm65_vm0, %v212_v57  ;;  %964 = vmatpush3.bf16.msra.mxu0 %v961_v49 }
  0x4f   :  { %980 = vmatpush3.bf16.msra.mxu1 %v977_v51  ;;  %834 = vmatprep.mubr.msk.f32.mxu0 %vm65_vm0, %v55_v58 }
  0x50   :  { %862 = vmatprep.mubr.msk.f32.mxu1 %vm65_vm0, %v213_v60  ;;  %966 = vmatprep.subr.bf16.mxu0 %v965_v59 }
  0x51   :  { %835 = vmatmul.mubr.msk.f32.gmra.mrb[6].mxu0 %vm65_vm0, %v56_v62  ;;  %982 = vmatprep.subr.bf16.mxu1 %v981_v61 }
  0x52   :  { %863 = vmatmul.mubr.msk.f32.gmra.mrb[6].mxu1 %vm65_vm0, %v214_v63  ;;  %968 = vmatpush3.bf16.msra.mxu0 %v965_v59 }
  0x53   :  { %984 = vmatpush3.bf16.msra.mxu1 %v981_v61  ;;  %881 = vmatprep.mubr.msk.f32.mxu0 %vm65_vm0, %v366_v0 }
  0x54   :  { %909 = vmatprep.mubr.msk.f32.mxu1 %vm65_vm0, %v525_v1 }
  0x55   :  { %882 = vmatmul.mubr.msk.f32.vlgmr.msra.gmra.mrb[8].mxu0 %vm65_vm0, %v367_v2 }
  0x56   :  { %910 = vmatmul.mubr.msk.f32.vlgmr.msra.gmra.mrb[8].mxu1 %vm65_vm0, %v526_v3  ;;  %884 = vmatprep.mubr.msk.f32.mxu0 %vm65_vm0, %v368_v4 }
  0x57   :  { %912 = vmatprep.mubr.msk.f32.mxu1 %vm65_vm0, %v527_v5 }
  0x59   :  { %885 = vmatmul.mubr.msk.f32.gmra.mrb[10].mxu0 %vm65_vm0, %v369_v6 }
  0x5a   :  { %913 = vmatmul.mubr.msk.f32.gmra.mrb[10].mxu1 %vm65_vm0, %v528_v7  ;;  %887 = vmatprep.mubr.msk.f32.mxu0 %vm65_vm0, %v370_v8 }
  0x5b   :  { %915 = vmatprep.mubr.msk.f32.mxu1 %vm65_vm0, %v529_v9 }
  0x5d   :  { %888 = vmatmul.mubr.msk.f32.gmra.mrb[12].mxu0 %vm65_vm0, %v371_v10 }
  0x5e   :  { %916 = vmatmul.mubr.msk.f32.gmra.mrb[12].mxu1 %vm65_vm0, %v530_v11  ;;  %890 = vmatprep.mubr.msk.f32.mxu0 %vm65_vm0, %v372_v12 }
  0x5f   :  { %918 = vmatprep.mubr.msk.f32.mxu1 %vm65_vm0, %v531_v13 }
  0x61   :  { %891 = vmatmul.mubr.msk.f32.gmra.mrb[14].mxu0 %vm65_vm0, %v373_v14 }
  0x62   :  { %919 = vmatmul.mubr.msk.f32.gmra.mrb[14].mxu1 %vm65_vm0, %v532_v15 }
 0x118   :  { %v827_v16 = vpop.f32.mrb[0].mxu0 }
 0x119   :  { %196 = vst [vmem:[#allocation9 + $0x8] sm:$0xff] %v827_v16  ;;  %v855_v17 = vpop.f32.mrb[0].mxu1  ;;  %v156_v18 = vpop.f32.mrb[1].mxu0 }
 0x11a   :  { %355 = vst [vmem:[#allocation9 + $0x48] sm:$0xff] %v855_v17  ;;  %195 = vst [vmem:[#allocation9] sm:$0xff] %v156_v18  ;;  %v314_v19 = vpop.f32.mrb[1].mxu1 }
 0x11b   :  { %354 = vst [vmem:[#allocation9 + $0x40] sm:$0xff] %v314_v19 }
 0x11c   :  { %v830_v20 = vpop.f32.mrb[2].mxu0 }
 0x11d   :  { %198 = vst [vmem:[#allocation9 + $0x18] sm:$0xff] %v830_v20  ;;  %v858_v21 = vpop.f32.mrb[2].mxu1  ;;  %v166_v22 = vpop.f32.mrb[3].mxu0 }
 0x11e   :  { %357 = vst [vmem:[#allocation9 + $0x58] sm:$0xff] %v858_v21  ;;  %197 = vst [vmem:[#allocation9 + $0x10] sm:$0xff] %v166_v22  ;;  %v324_v23 = vpop.f32.mrb[3].mxu1 }
 0x11f   :  { %356 = vst [vmem:[#allocation9 + $0x50] sm:$0xff] %v324_v23 }
 0x120   :  { %v833_v24 = vpop.f32.mrb[4].mxu0 }
 0x121   :  { %200 = vst [vmem:[#allocation9 + $0x28] sm:$0xff] %v833_v24  ;;  %v861_v25 = vpop.f32.mrb[4].mxu1  ;;  %v176_v26 = vpop.f32.mrb[5].mxu0 }
 0x122   :  { %359 = vst [vmem:[#allocation9 + $0x68] sm:$0xff] %v861_v25  ;;  %199 = vst [vmem:[#allocation9 + $0x20] sm:$0xff] %v176_v26  ;;  %v334_v27 = vpop.f32.mrb[5].mxu1 }
 0x123   :  { %358 = vst [vmem:[#allocation9 + $0x60] sm:$0xff] %v334_v27 }
 0x124   :  { %v836_v28 = vpop.f32.mrb[6].mxu0 }
 0x125   :  { %202 = vst [vmem:[#allocation9 + $0x38] sm:$0xff] %v836_v28  ;;  %v864_v29 = vpop.f32.mrb[6].mxu1  ;;  %v186_v30 = vpop.f32.mrb[7].mxu0 }
 0x126   :  { %361 = vst [vmem:[#allocation9 + $0x78] sm:$0xff] %v864_v29  ;;  %201 = vst [vmem:[#allocation9 + $0x30] sm:$0xff] %v186_v30  ;;  %v344_v31 = vpop.f32.mrb[7].mxu1 }
 0x127   :  { %360 = vst [vmem:[#allocation9 + $0x70] sm:$0xff] %v344_v31 }
 0x128   :  { %v883_v32 = vpop.f32.mrb[8].mxu0 }
 0x129   :  { %514 = vst [vmem:[#allocation9 + $0x88] sm:$0xff] %v883_v32  ;;  %v911_v33 = vpop.f32.mrb[8].mxu1  ;;  %v473_v34 = vpop.f32.mrb[9].mxu0 }
 0x12a   :  { %673 = vst [vmem:[#allocation9 + $0xc8] sm:$0xff] %v911_v33  ;;  %513 = vst [vmem:[#allocation9 + $0x80] sm:$0xff] %v473_v34  ;;  %v632_v35 = vpop.f32.mrb[9].mxu1 }
 0x12b   :  { %672 = vst [vmem:[#allocation9 + $0xc0] sm:$0xff] %v632_v35 }
 0x12c   :  { %v886_v36 = vpop.f32.mrb[10].mxu0 }
 0x12d   :  { %516 = vst [vmem:[#allocation9 + $0x98] sm:$0xff] %v886_v36  ;;  %v914_v37 = vpop.f32.mrb[10].mxu1  ;;  %v483_v38 = vpop.f32.mrb[11].mxu0 }
 0x12e   :  { %675 = vst [vmem:[#allocation9 + $0xd8] sm:$0xff] %v914_v37  ;;  %515 = vst [vmem:[#allocation9 + $0x90] sm:$0xff] %v483_v38  ;;  %v642_v39 = vpop.f32.mrb[11].mxu1 }
 0x12f   :  { %674 = vst [vmem:[#allocation9 + $0xd0] sm:$0xff] %v642_v39 }
 0x130   :  { %v889_v40 = vpop.f32.mrb[12].mxu0 }
 0x131   :  { %518 = vst [vmem:[#allocation9 + $0xa8] sm:$0xff] %v889_v40  ;;  %v917_v41 = vpop.f32.mrb[12].mxu1  ;;  %v493_v42 = vpop.f32.mrb[13].mxu0 }
 0x132   :  { %677 = vst [vmem:[#allocation9 + $0xe8] sm:$0xff] %v917_v41  ;;  %517 = vst [vmem:[#allocation9 + $0xa0] sm:$0xff] %v493_v42  ;;  %v652_v43 = vpop.f32.mrb[13].mxu1 }
 0x133   :  { %676 = vst [vmem:[#allocation9 + $0xe0] sm:$0xff] %v652_v43 }
 0x134   :  { %v892_v44 = vpop.f32.mrb[14].mxu0 }
 0x135   :  { %520 = vst [vmem:[#allocation9 + $0xb8] sm:$0xff] %v892_v44  ;;  %v920_v45 = vpop.f32.mrb[14].mxu1  ;;  %v503_v46 = vpop.f32.mrb[15].mxu0 }
 0x136   :  { %679 = vst [vmem:[#allocation9 + $0xf8] sm:$0xff] %v920_v45  ;;  %519 = vst [vmem:[#allocation9 + $0xb0] sm:$0xff] %v503_v46  ;;  %v662_v47 = vpop.f32.mrb[15].mxu1 }
 0x137   :  { %678 = vst [vmem:[#allocation9 + $0xf0] sm:$0xff] %v662_v47 }
 0x138   :  { %1056 = shalt.err (!%p1053_p9)
}
 0x139   :  { %s1057_s9 = scalar_lea.hbm %s1239_s3, 4096 }
 0x13a   :  { %p1058_p10 = scmp.ne.s32.totalorder %s1239_s3, %s1057_s9  ;;  %p1061_p11 = scmp.lt.u32.totalorder %s1057_s9, %s1239_s3 }
 0x13c   :  { %p1063_p12 = pnand %p1061_p11, %p1058_p10 }
 0x13e   :  { %1066 = shalt.err (!%p1063_p12)
}
 0x13f   :  { %691 = dma.vmem_to_hbm [thread:$0]  %s686_s0, 4096, %s1239_s3, [#allocation6], %s1077_s4, %s1077_s4, %s1078_s5  }
 0x140   :  { %1073 = dma.done.wait [#allocation6], 4096  }
 0x141   :  { %1074 = vsyncadd [#allocation6], 4294963200 }
 0x142   :  { %695 = vsyncpa [#allocation5], 1 }
 0x143   :  { %696 = vsyncpa [#allocation8], 1 }
 0x144   :  { %697 = vsyncpa [#allocation6], 1 }

</bundles_post_ra>
